<compile_context>
chip_gen: v7x
topology: tpu7x:2x2x1
jax: 0.10.0
libtpu: 0.0.40
codegen_flags: <defaults>
</compile_context>

<pallas_src>
import functools

import jax
import jax.numpy as jnp
from jax.experimental import pallas as pl
from jax.experimental.pallas import tpu as pltpu


def _silu_kernel(x_ref, o_ref, *, compute_dtype):
    x = x_ref[...].astype(compute_dtype)
    half = jnp.asarray(0.5, compute_dtype)
    one = jnp.asarray(1.0, compute_dtype)
    # x * sigmoid(x) == 0.5 * x * (1 + tanh(0.5 * x))  -- one EUP op per element.
    o_ref[...] = (half * x * (jnp.tanh(half * x) + one)).astype(o_ref.dtype)


def _chip_kind():
    try:
        return jax.devices()[0].device_kind.lower()
    except Exception:
        return ""


def _default_block_bytes(kind):
    if "v5" in kind:
        return 3 << 20   # 4 double-buffered blocks = 12 MiB < 16 MiB scoped VMEM
    if "v7" in kind:
        return 6 << 20   # 24 MiB < 32 MiB scoped VMEM; bigger DMAs at 3.2 TB/s
    return 4 << 20       # v6e / default: 16 MiB < 32 MiB scoped VMEM


def _compute_dtype(dtype, kind):
    d = jnp.dtype(dtype)
    low_prec = d in (jnp.dtype(jnp.bfloat16), jnp.dtype(jnp.float16))
    if low_prec and ("v6" in kind or "v7" in kind):
        return dtype      # bf16-capable VPU/EUP: stay native, halve vreg traffic
    return jnp.float32


def silu_pallas(x, *, target_block_bytes=None, donate=False):
    """Elementwise SiLU on an arbitrary-shaped array via a Pallas TPU kernel.

    If donate=True, callers should donate x; the output aliases the input HBM
    buffer (halves the kernel's HBM footprint, same bandwidth).
    """
    orig_shape = x.shape
    dtype = x.dtype
    n = x.size
    if n == 0:
        return x
    itemsize = jnp.dtype(dtype).itemsize

    kind = _chip_kind()
    if target_block_bytes is None:
        target_block_bytes = _default_block_bytes(kind)
    compute_dtype = _compute_dtype(dtype, kind)
    sublane = max(8, 32 // itemsize)   # 8 (f32) / 16 (bf16, f16) / 32 (1-byte)

    x_flat = jnp.ravel(x)

    # Widest lane dim (multiple of 128) that divides the flat length exactly.
    lanes = None
    for cand in (1024, 512, 256, 128):
        if n % cand == 0:
            lanes = cand
            break

    pad = 0
    if lanes is None:
        if n * itemsize <= target_block_bytes:
            # Single tiny block; full-array-dim exception to the 128-lane rule,
            # no padding pass needed.
            lanes = n
        else:
            # TODO(synk): mask the ragged tail in-kernel instead of pad + slice.
            lanes = 128
            pad = (-n) % lanes
            x_flat = jnp.pad(x_flat, (0, pad))

    n_pad = n + pad
    rows = n_pad // lanes
    x2d = x_flat.reshape(rows, lanes)

    # Rows per block: ~target_block_bytes, rounded to the packed sublane tile.
    rows_per_block = max(sublane, target_block_bytes // (lanes * itemsize))
    rows_per_block = (rows_per_block // sublane) * sublane
    # If the whole array fits one block, use the full (possibly non-multiple)
    # row count -- allowed because it equals the full array dim.
    tile_rows = rows if rows <= rows_per_block else rows_per_block

    grid = (pl.cdiv(rows, tile_rows),)

    cost = pl.CostEstimate(
        flops=4 * n_pad,
        transcendentals=n_pad,           # one tanh per element
        bytes_accessed=2 * n_pad * itemsize,
    )

    kernel = functools.partial(_silu_kernel, compute_dtype=compute_dtype)

    out2d = pl.pallas_call(
        kernel,
        out_shape=jax.ShapeDtypeStruct((rows, lanes), dtype),
        grid=grid,
        in_specs=[pl.BlockSpec((tile_rows, lanes), lambda i: (i, 0))],
        out_specs=pl.BlockSpec((tile_rows, lanes), lambda i: (i, 0)),
        compiler_params=pltpu.CompilerParams(
            dimension_semantics=("parallel",),
        ),
        cost_estimate=cost,
        input_output_aliases=({0: 0} if donate else {}),
    )(x2d)

    out_flat = out2d.reshape(-1)
    if pad:
        out_flat = out_flat[:n]
    return out_flat.reshape(orig_shape)


def silu_ref(x):
    xf = x.astype(jnp.float32)
    return (xf * jax.nn.sigmoid(xf)).astype(x.dtype)


if __name__ == "__main__":
    key = jax.random.PRNGKey(0)

    # NCHW feature map, consistent with the module's typical conv inputs.
    x = jax.random.normal(key, (2, 4, 16, 16), dtype=jnp.float32)
    y = silu_pallas(x)
    jax.block_until_ready(y)
    y_ref = silu_ref(x)
    assert y.shape == x.shape and y.dtype == x.dtype
    assert jnp.allclose(y, y_ref, atol=1e-5, rtol=1e-5)

    # Larger, bandwidth-relevant shape (wide-lane, multi-row path).
    x_big = jax.random.normal(jax.random.PRNGKey(1), (2, 64, 64, 64),
                              dtype=jnp.float32)
    y_big = silu_pallas(x_big)
    jax.block_until_ready(y_big)
    assert jnp.allclose(y_big, silu_ref(x_big), atol=1e-5, rtol=1e-5)

    # Odd total size (not a multiple of 128): exercises the pad-free tiny path.
    x_odd = jax.random.normal(jax.random.PRNGKey(2), (2, 3, 7, 5),
                              dtype=jnp.float32)
    y_odd = silu_pallas(x_odd)
    jax.block_until_ready(y_odd)
    assert jnp.allclose(y_odd, silu_ref(x_odd), atol=1e-5, rtol=1e-5)

    # bf16 path (native compute on v6e/v7x, f32 upcast elsewhere).
    x_bf = jax.random.normal(jax.random.PRNGKey(3), (2, 4, 16, 16),
                             dtype=jnp.bfloat16)
    y_bf = silu_pallas(x_bf)
    jax.block_until_ready(y_bf)
    assert y_bf.dtype == jnp.bfloat16
    assert jnp.allclose(y_bf.astype(jnp.float32),
                        silu_ref(x_bf).astype(jnp.float32),
                        atol=5e-2, rtol=5e-2)

    print("KERNEL_OK")
</pallas_src>

<mosaic_0001>
module attributes {stable_mosaic.version = 11 : i64} {
  func.func @_silu_kernel(%arg0: i32, %arg1: memref<2x1024xf32, #tpu.memory_space<vmem>>, %arg2: memref<2x1024xf32, #tpu.memory_space<vmem>>) attributes {dimension_semantics = [#tpu.dimension_semantics<parallel>], iteration_bounds = array<i64: 1>, scalar_prefetch = 0 : i64, scratch_operands = 0 : i64, tpu.core_type = #tpu.core_type<tc>, window_params = [{transform_indices = @transform_0, window_bounds = array<i64: 2, 1024>}, {transform_indices = @transform_1, window_bounds = array<i64: 2, 1024>}]} {
    %c0 = arith.constant 0 : index
    %c0_0 = arith.constant 0 : index
    %0 = vector.load %arg1[%c0, %c0_0] : memref<2x1024xf32, #tpu.memory_space<vmem>>, vector<2x1024xf32>
    %cst = arith.constant 5.000000e-01 : f32
    %1 = vector.broadcast %cst : f32 to vector<2x1024xf32>
    %2 = arith.mulf %1, %0 : vector<2x1024xf32>
    %cst_1 = arith.constant 5.000000e-01 : f32
    %3 = vector.broadcast %cst_1 : f32 to vector<2x1024xf32>
    %4 = arith.mulf %3, %0 : vector<2x1024xf32>
    %5 = math.tanh %4 : vector<2x1024xf32>
    %cst_2 = arith.constant 1.000000e+00 : f32
    %6 = vector.broadcast %cst_2 : f32 to vector<2x1024xf32>
    %7 = arith.addf %5, %6 : vector<2x1024xf32>
    %8 = arith.mulf %2, %7 : vector<2x1024xf32>
    %c0_3 = arith.constant 0 : index
    %c0_4 = arith.constant 0 : index
    %9 = vector.load %arg2[%c0_3, %c0_4] : memref<2x1024xf32, #tpu.memory_space<vmem>>, vector<2x1024xf32>
    tpu.vector_store %arg2[%c0_3, %c0_4], %8 {strides = array<i32>} : memref<2x1024xf32, #tpu.memory_space<vmem>>, vector<2x1024xf32>,
    return
  }
  func.func @transform_0(%arg0: i32) -> (i32, i32) {
    %c0_i32 = arith.constant 0 : i32
    %c0_i32_0 = arith.constant 0 : i32
    return %arg0, %c0_i32 : i32, i32
  }
  func.func @transform_1(%arg0: i32) -> (i32, i32) {
    %c0_i32 = arith.constant 0 : i32
    %c0_i32_0 = arith.constant 0 : i32
    return %arg0, %c0_i32 : i32, i32
  }
}

</mosaic_0001>

<bundles_post_ra>
// kernel: tpu_custom_call.1
= control target key start
LH: loop header
LB: loop body
LE: loop exit
PB: predicated region body
PF: predicated region fallthrough
CT: control target
= control target key end

     0   :  { %6 = vsyncpa [#allocation3], 0  ;;  %s138_s0 = inlined_call_operand.hbm [shape: f32[2,1024], index: 0, kind: input, shape index: {}]   ;;  %s139_s1 = inlined_call_operand.hbm [shape: f32[2,1024], index: 1, kind: output, shape index: {}]  }
   0x1   :  { %7 = vsyncpa [#allocation4], 0  ;;  %s102_s6 = smov [#allocation2]   ;;  %s54_s10 = scalar_lea.hbm %s138_s0, 256 }
   0x2   :  { %s14_s7 = sshll.u32 %s102_s6, 4  ;;  %p55_p0 = scmp.ne.s32.totalorder %s138_s0, %s54_s10  ;;  %s15_s7 = int_to_ptr.vmem [resolvable:$true] %s14_s7 }
   0x3   :  { %p58_p1 = scmp.lt.u32.totalorder %s54_s10, %s138_s0 }
   0x5   :  { %p60_p2 = pnand %p58_p1, %p55_p0 }
   0x7   :  { %63 = shalt.err (!%p60_p2)
}
   0x8   :  { %s64_s15 = scalar_lea.vmem %s15_s7, 256  ;;  %p69_p4 = scmp.lt.s32.totalorder %s15_s7, %s15_s7 }
   0x9   :  { %p65_p3 = scmp.ne.s32.totalorder %s15_s7, %s64_s15  ;;  %p70_p5 = scmp.lt.s32.totalorder %s64_s15, %s64_s15 }
   0xb   :  { %p71_p6 = por %p70_p5, %p69_p4 }
   0xd   :  { %p72_p7 = pnand %p71_p6, %p65_p3 }
   0xf   :  { %75 = shalt.err (!%p72_p7)
}
  0x10   :  { %17 = dma.hbm_to_vmem [thread:$0]  %s138_s0, 256, %s15_s7, [#allocation3]  }
  0x11   :  { %98 = dma.done.wait [#allocation3], 256  }
  0x12   :  { %99 = vsyncadd [#allocation3], 4294967040  ;;  %v21_v0 = vld [vmem:[#allocation2] sm:$0xff]  ;;  %v22_v1 = vld [vmem:[#allocation2 + $0x8] sm:$0xff]  ;;  %s103_s18 = smov [#allocation5]  }
  0x13   :  { %v23_v2 = vmul.f32 0.5, %v21_v0  ;;  %v24_v3 = vmul.f32 0.5, %v22_v1  ;;  %s39_s19 = sshll.u32 %s103_s18, 4  ;;  %s40_s19 = int_to_ptr.vmem [resolvable:$true] %s39_s19 }
  0x14   :  { %s76_s0 = scalar_lea.vmem %s40_s19, 256  ;;  %p81_p9 = scmp.lt.s32.totalorder %s40_s19, %s40_s19 }
  0x15   :  { %50 = vtanh.f32 %v23_v2  ;;  %p77_p8 = scmp.ne.s32.totalorder %s40_s19, %s76_s0  ;;  %p82_p10 = scmp.lt.s32.totalorder %s76_s0, %s76_s0 }
  0x16   :  { %52 = vtanh.f32 %v24_v3 }
  0x17   :  { %p83_p11 = por %p82_p10, %p81_p9 }
  0x19   :  { %p84_p12 = pnand %p83_p11, %p77_p8 }
  0x1f   :  { %v51_v4 = vpop.eup %50 }
  0x20   :  { %v53_v5 = vpop.eup %52  ;;  %v27_v6 = vadd.f32 1.0, %v51_v4 }
  0x21   :  { %v28_v7 = vadd.f32 1.0, %v53_v5 }
  0x22   :  { %v29_v8 = vmul.f32 %v27_v6, %v23_v2 }
  0x23   :  { %v30_v9 = vmul.f32 %v28_v7, %v24_v3 }
  0x24   :  { %31 = vst [vmem:[#allocation5] sm:$0xff] %v29_v8 }
  0x25   :  { %32 = vst [vmem:[#allocation5 + $0x8] sm:$0xff] %v30_v9 }
  0x26   :  { %87 = shalt.err (!%p84_p12)
}
  0x27   :  { %s88_s22 = scalar_lea.hbm %s139_s1, 256 }
  0x28   :  { %p89_p13 = scmp.ne.s32.totalorder %s139_s1, %s88_s22  ;;  %p92_p0 = scmp.lt.u32.totalorder %s88_s22, %s139_s1 }
  0x2a   :  { %p94_p1 = pnand %p92_p0, %p89_p13 }
  0x2c   :  { %97 = shalt.err (!%p94_p1)
}
  0x2d   :  { %42 = dma.vmem_to_hbm [thread:$0]  %s40_s19, 256, %s139_s1, [#allocation4]  }
  0x2e   :  { %100 = dma.done.wait [#allocation4], 256  }
  0x2f   :  { %101 = vsyncadd [#allocation4], 4294967040 }
  0x30   :  { %46 = vsyncpa [#allocation3], 1 }
  0x31   :  { %47 = vsyncpa [#allocation4], 1 }

</bundles_post_ra>
